<compile_context>
chip_gen: v7x
topology: tpu7x:2x2x1
jax: 0.10.0
libtpu: 0.0.40
codegen_flags: <defaults>
</compile_context>

<pallas_src>
import jax
import jax.numpy as jnp
from jax.experimental import pallas as pl
from jax.experimental.pallas import tpu as pltpu

LANE = 128


def autoencoder_kernel(x_ref,
                       we1_ref, be1_ref, we2_ref, be2_ref,
                       wd1_ref, bd1_ref, wd2_ref, bd2_ref,
                       y_ref):
    """Fused encoder (D_in->H->Z) + decoder (Z->H->D_out) for one batch tile.

    x_ref and all weight refs hold bf16; biases are f32; every jnp.dot
    accumulates in f32 on the MXU, bias-add / ReLU run in f32 on the VPU.
    """
    f32 = jnp.float32
    bf16 = jnp.bfloat16

    x = x_ref[...]                                                    # bf16

    # ---- encoder ----
    h = jnp.dot(x, we1_ref[...], preferred_element_type=f32) + be1_ref[...]
    h = jnp.maximum(h, 0.0).astype(bf16)                              # ReLU
    z = jnp.dot(h, we2_ref[...], preferred_element_type=f32) + be2_ref[...]
    z = z.astype(bf16)

    # ---- decoder ----
    h2 = jnp.dot(z, wd1_ref[...], preferred_element_type=f32) + bd1_ref[...]
    h2 = jnp.maximum(h2, 0.0).astype(bf16)                            # ReLU
    y = jnp.dot(h2, wd2_ref[...], preferred_element_type=f32) + bd2_ref[...]

    y_ref[...] = y.astype(y_ref.dtype)


def _pad_axis(a, axis, mult):
    """Zero-pad `a` along `axis` up to a multiple of `mult` (exact math)."""
    pad = (-a.shape[axis]) % mult
    if pad == 0:
        return a
    widths = [(0, 0)] * a.ndim
    widths[axis] = (0, pad)
    return jnp.pad(a, widths)


def _pick_tile_b(B, target=512):
    """Pick the batch-tile size.

    Goals: >=128 rows (fill the MXU M dim, amortize ~0.35us/step overhead),
    >=2 grid steps when the batch allows (both v7x TensorCores busy), and a
    multiple of 8 so the (8,128) sublane/lane rule holds; a ragged last tile
    is masked automatically by Pallas.
    """
    if B <= 128:
        return B                              # single full block
    tile = min(target, -(-B // 2))            # ceil(B/2): >= 2 grid steps
    tile = max(128, (tile // 8) * 8)
    return min(tile, B)


def autoencoder_forward(x, params, *, tile_b=None, tile_target=512):
    """Runs the fused autoencoder kernel, tiling over the batch dimension."""
    B, D_in = x.shape
    we1, be1, we2, be2, wd1, bd1, wd2, bd2 = params
    D_out = wd2.shape[1]
    out_dtype = x.dtype

    if tile_b is None:
        tile_b = _pick_tile_b(B, tile_target)
    grid = (pl.cdiv(B, tile_b),)

    # --- lane-pad hidden/latent dims to 128 (zero pad => exact) ---
    we1p = _pad_axis(we1, 1, LANE)
    be1p = _pad_axis(be1, 1, LANE)
    we2p = _pad_axis(_pad_axis(we2, 0, LANE), 1, LANE)
    be2p = _pad_axis(be2, 1, LANE)
    wd1p = _pad_axis(_pad_axis(wd1, 0, LANE), 1, LANE)
    bd1p = _pad_axis(bd1, 1, LANE)
    wd2p = _pad_axis(wd2, 0, LANE)
    bd2p = bd2

    # bf16 operands for the MXU (weights resident, ~300 KB); biases stay f32.
    bf16 = jnp.bfloat16
    kparams = (we1p.astype(bf16), be1p.astype(jnp.float32),
               we2p.astype(bf16), be2p.astype(jnp.float32),
               wd1p.astype(bf16), bd1p.astype(jnp.float32),
               wd2p.astype(bf16), bd2p.astype(jnp.float32))
    x_k = x.astype(bf16)                      # halve streaming HBM reads

    def x_map(i):
        return (i, 0)

    def bcast(i):
        return (0, 0)

    weight_specs = [pl.BlockSpec(p.shape, bcast) for p in kparams]

    # Advisory cost estimate so XLA can overlap this call with neighbors.
    Hp, Zp = we1p.shape[1], we2p.shape[1]
    flops = 2 * B * (D_in * Hp + Hp * Zp + Zp * Hp + Hp * D_out)
    bytes_accessed = (x_k.size * x_k.dtype.itemsize
                      + B * D_out * jnp.dtype(out_dtype).itemsize
                      + sum(int(p.size) * p.dtype.itemsize for p in kparams))
    cost = pl.CostEstimate(flops=int(flops), transcendentals=0,
                           bytes_accessed=int(bytes_accessed))

    return pl.pallas_call(
        autoencoder_kernel,
        out_shape=jax.ShapeDtypeStruct((B, D_out), out_dtype),
        grid_spec=pltpu.PrefetchScalarGridSpec(
            num_scalar_prefetch=0,
            grid=grid,
            in_specs=[pl.BlockSpec((tile_b, D_in), x_map)] + weight_specs,
            out_specs=pl.BlockSpec((tile_b, D_out), x_map),
        ),
        compiler_params=pltpu.CompilerParams(
            dimension_semantics=("parallel",)),
        cost_estimate=cost,
    )(x_k, *kparams)


def init_linear(key, fan_in, fan_out, dtype=jnp.float32):
    """PyTorch nn.Linear default init: U(-k, k), k = 1/sqrt(fan_in).
    Weight returned already transposed to (in, out)."""
    kw, kb = jax.random.split(key)
    k = 1.0 / jnp.sqrt(jnp.asarray(fan_in, dtype))
    w = jax.random.uniform(kw, (fan_in, fan_out), dtype, -k, k)
    b = jax.random.uniform(kb, (1, fan_out), dtype, -k, k)
    return w, b


def reference_forward(x, params):
    we1, be1, we2, be2, wd1, bd1, wd2, bd2 = params
    h = jnp.maximum(x @ we1 + be1, 0.0)
    z = h @ we2 + be2
    h2 = jnp.maximum(z @ wd1 + bd1, 0.0)
    return h2 @ wd2 + bd2


if __name__ == "__main__":
    # encoder_args = [256, 64, 32], decoder_args = [32, 64, 256]
    B, D_IN, HID, LAT = 256, 256, 64, 32

    key = jax.random.PRNGKey(0)
    kx, k1, k2, k3, k4 = jax.random.split(key, 5)

    x = jax.random.normal(kx, (B, D_IN), jnp.float32)

    we1, be1 = init_linear(k1, D_IN, HID)   # encoder layer 1
    we2, be2 = init_linear(k2, HID, LAT)    # encoder layer 2 (latent)
    wd1, bd1 = init_linear(k3, LAT, HID)    # decoder layer 1
    wd2, bd2 = init_linear(k4, HID, D_IN)   # decoder layer 2 (reconstruction)
    params = (we1, be1, we2, be2, wd1, bd1, wd2, bd2)

    y = autoencoder_forward(x, params)      # auto-tiled: 2 x 128-row tiles
    y = jax.block_until_ready(y)

    y_ref = reference_forward(x, params)    # f32 reference
    assert y.shape == (B, D_IN)
    # bf16 MXU operands with f32 accumulation -> loosened tolerance.
    assert jnp.allclose(y, y_ref, atol=5e-2, rtol=5e-2), "mismatch vs reference"

    print("KERNEL_OK")
</pallas_src>

<mosaic_0001>
module attributes {stable_mosaic.version = 11 : i64} {
  func.func @autoencoder_kernel(%arg0: i32, %arg1: memref<128x256xbf16, #tpu.memory_space<vmem>>, %arg2: memref<256x128xbf16, #tpu.memory_space<vmem>>, %arg3: memref<1x128xf32, #tpu.memory_space<vmem>>, %arg4: memref<128x128xbf16, #tpu.memory_space<vmem>>, %arg5: memref<1x128xf32, #tpu.memory_space<vmem>>, %arg6: memref<128x128xbf16, #tpu.memory_space<vmem>>, %arg7: memref<1x128xf32, #tpu.memory_space<vmem>>, %arg8: memref<128x256xbf16, #tpu.memory_space<vmem>>, %arg9: memref<1x256xf32, #tpu.memory_space<vmem>>, %arg10: memref<128x256xf32, #tpu.memory_space<vmem>>) attributes {dimension_semantics = [#tpu.dimension_semantics<parallel>], iteration_bounds = array<i64: 2>, scalar_prefetch = 0 : i64, scratch_operands = 0 : i64, tpu.core_type = #tpu.core_type<tc>, window_params = [{transform_indices = @transform_0, window_bounds = array<i64: 128, 256>}, {pipeline_mode = #tpu.pipeline_mode<synchronous>, transform_indices = @transform_1, window_bounds = array<i64: 256, 128>}, {pipeline_mode = #tpu.pipeline_mode<synchronous>, transform_indices = @transform_2, window_bounds = array<i64: 1, 128>}, {pipeline_mode = #tpu.pipeline_mode<synchronous>, transform_indices = @transform_3, window_bounds = array<i64: 128, 128>}, {pipeline_mode = #tpu.pipeline_mode<synchronous>, transform_indices = @transform_4, window_bounds = array<i64: 1, 128>}, {pipeline_mode = #tpu.pipeline_mode<synchronous>, transform_indices = @transform_5, window_bounds = array<i64: 128, 128>}, {pipeline_mode = #tpu.pipeline_mode<synchronous>, transform_indices = @transform_6, window_bounds = array<i64: 1, 128>}, {pipeline_mode = #tpu.pipeline_mode<synchronous>, transform_indices = @transform_7, window_bounds = array<i64: 128, 256>}, {pipeline_mode = #tpu.pipeline_mode<synchronous>, transform_indices = @transform_8, window_bounds = array<i64: 1, 256>}, {transform_indices = @transform_9, window_bounds = array<i64: 128, 256>}]} {
    %c0 = arith.constant 0 : index
    %c0_0 = arith.constant 0 : index
    %0 = vector.load %arg1[%c0, %c0_0] : memref<128x256xbf16, #tpu.memory_space<vmem>>, vector<128x256xbf16>
    %c0_1 = arith.constant 0 : index
    %c0_2 = arith.constant 0 : index
    %1 = vector.load %arg2[%c0_1, %c0_2] : memref<256x128xbf16, #tpu.memory_space<vmem>>, vector<256x128xbf16>
    %cst = arith.constant dense<0.000000e+00> : vector<128x128xf32>
    %2 = tpu.matmul %0, %1, %cst {dimension_numbers = #tpu.dot_dimension_numbers<[1], [0], [0], [1], [0, 0, 1, 1], [], []>} : vector<128x256xbf16>, vector<256x128xbf16>, vector<128x128xf32> -> vector<128x128xf32>
    %c0_3 = arith.constant 0 : index
    %c0_4 = arith.constant 0 : index
    %3 = vector.load %arg3[%c0_3, %c0_4] : memref<1x128xf32, #tpu.memory_space<vmem>>, vector<1x128xf32>
    %4 = vector.broadcast %3 : vector<1x128xf32> to vector<128x128xf32>
    %5 = arith.addf %2, %4 : vector<128x128xf32>
    %cst_5 = arith.constant 0.000000e+00 : f32
    %6 = vector.broadcast %cst_5 : f32 to vector<128x128xf32>
    %7 = arith.maximumf %5, %6 : vector<128x128xf32>
    %8 = arith.truncf %7 : vector<128x128xf32> to vector<128x128xbf16>
    %c0_6 = arith.constant 0 : index
    %c0_7 = arith.constant 0 : index
    %9 = vector.load %arg4[%c0_6, %c0_7] : memref<128x128xbf16, #tpu.memory_space<vmem>>, vector<128x128xbf16>
    %cst_8 = arith.constant dense<0.000000e+00> : vector<128x128xf32>
    %10 = tpu.matmul %8, %9, %cst_8 {dimension_numbers = #tpu.dot_dimension_numbers<[1], [0], [0], [1], [0, 0, 1, 1], [], []>} : vector<128x128xbf16>, vector<128x128xbf16>, vector<128x128xf32> -> vector<128x128xf32>
    %c0_9 = arith.constant 0 : index
    %c0_10 = arith.constant 0 : index
    %11 = vector.load %arg5[%c0_9, %c0_10] : memref<1x128xf32, #tpu.memory_space<vmem>>, vector<1x128xf32>
    %12 = vector.broadcast %11 : vector<1x128xf32> to vector<128x128xf32>
    %13 = arith.addf %10, %12 : vector<128x128xf32>
    %14 = arith.truncf %13 : vector<128x128xf32> to vector<128x128xbf16>
    %c0_11 = arith.constant 0 : index
    %c0_12 = arith.constant 0 : index
    %15 = vector.load %arg6[%c0_11, %c0_12] : memref<128x128xbf16, #tpu.memory_space<vmem>>, vector<128x128xbf16>
    %cst_13 = arith.constant dense<0.000000e+00> : vector<128x128xf32>
    %16 = tpu.matmul %14, %15, %cst_13 {dimension_numbers = #tpu.dot_dimension_numbers<[1], [0], [0], [1], [0, 0, 1, 1], [], []>} : vector<128x128xbf16>, vector<128x128xbf16>, vector<128x128xf32> -> vector<128x128xf32>
    %c0_14 = arith.constant 0 : index
    %c0_15 = arith.constant 0 : index
    %17 = vector.load %arg7[%c0_14, %c0_15] : memref<1x128xf32, #tpu.memory_space<vmem>>, vector<1x128xf32>
    %18 = vector.broadcast %17 : vector<1x128xf32> to vector<128x128xf32>
    %19 = arith.addf %16, %18 : vector<128x128xf32>
    %cst_16 = arith.constant 0.000000e+00 : f32
    %20 = vector.broadcast %cst_16 : f32 to vector<128x128xf32>
    %21 = arith.maximumf %19, %20 : vector<128x128xf32>
    %22 = arith.truncf %21 : vector<128x128xf32> to vector<128x128xbf16>
    %c0_17 = arith.constant 0 : index
    %c0_18 = arith.constant 0 : index
    %23 = vector.load %arg8[%c0_17, %c0_18] : memref<128x256xbf16, #tpu.memory_space<vmem>>, vector<128x256xbf16>
    %cst_19 = arith.constant dense<0.000000e+00> : vector<128x256xf32>
    %24 = tpu.matmul %22, %23, %cst_19 {dimension_numbers = #tpu.dot_dimension_numbers<[1], [0], [0], [1], [0, 0, 1, 1], [], []>} : vector<128x128xbf16>, vector<128x256xbf16>, vector<128x256xf32> -> vector<128x256xf32>
    %c0_20 = arith.constant 0 : index
    %c0_21 = arith.constant 0 : index
    %25 = vector.load %arg9[%c0_20, %c0_21] : memref<1x256xf32, #tpu.memory_space<vmem>>, vector<1x256xf32>
    %26 = vector.broadcast %25 : vector<1x256xf32> to vector<128x256xf32>
    %27 = arith.addf %24, %26 : vector<128x256xf32>
    %c0_22 = arith.constant 0 : index
    %c0_23 = arith.constant 0 : index
    %28 = vector.load %arg10[%c0_22, %c0_23] : memref<128x256xf32, #tpu.memory_space<vmem>>, vector<128x256xf32>
    tpu.vector_store %arg10[%c0_22, %c0_23], %27 {strides = array<i32>} : memref<128x256xf32, #tpu.memory_space<vmem>>, vector<128x256xf32>,
    return
  }
  func.func @transform_0(%arg0: i32) -> (i32, i32) {
    %c0_i32 = arith.constant 0 : i32
    %c0_i32_0 = arith.constant 0 : i32
    return %arg0, %c0_i32 : i32, i32
  }
  func.func @transform_1(%arg0: i32) -> (i32, i32) {
    %c0_i32 = arith.constant 0 : i32
    %c0_i32_0 = arith.constant 0 : i32
    %c0_i32_1 = arith.constant 0 : i32
    return %c0_i32, %c0_i32_0 : i32, i32
  }
  func.func @transform_2(%arg0: i32) -> (i32, i32) {
    %c0_i32 = arith.constant 0 : i32
    %c0_i32_0 = arith.constant 0 : i32
    %c0_i32_1 = arith.constant 0 : i32
    return %c0_i32, %c0_i32_0 : i32, i32
  }
  func.func @transform_3(%arg0: i32) -> (i32, i32) {
    %c0_i32 = arith.constant 0 : i32
    %c0_i32_0 = arith.constant 0 : i32
    %c0_i32_1 = arith.constant 0 : i32
    return %c0_i32, %c0_i32_0 : i32, i32
  }
  func.func @transform_4(%arg0: i32) -> (i32, i32) {
    %c0_i32 = arith.constant 0 : i32
    %c0_i32_0 = arith.constant 0 : i32
    %c0_i32_1 = arith.constant 0 : i32
    return %c0_i32, %c0_i32_0 : i32, i32
  }
  func.func @transform_5(%arg0: i32) -> (i32, i32) {
    %c0_i32 = arith.constant 0 : i32
    %c0_i32_0 = arith.constant 0 : i32
    %c0_i32_1 = arith.constant 0 : i32
    return %c0_i32, %c0_i32_0 : i32, i32
  }
  func.func @transform_6(%arg0: i32) -> (i32, i32) {
    %c0_i32 = arith.constant 0 : i32
    %c0_i32_0 = arith.constant 0 : i32
    %c0_i32_1 = arith.constant 0 : i32
    return %c0_i32, %c0_i32_0 : i32, i32
  }
  func.func @transform_7(%arg0: i32) -> (i32, i32) {
    %c0_i32 = arith.constant 0 : i32
    %c0_i32_0 = arith.constant 0 : i32
    %c0_i32_1 = arith.constant 0 : i32
    return %c0_i32, %c0_i32_0 : i32, i32
  }
  func.func @transform_8(%arg0: i32) -> (i32, i32) {
    %c0_i32 = arith.constant 0 : i32
    %c0_i32_0 = arith.constant 0 : i32
    %c0_i32_1 = arith.constant 0 : i32
    return %c0_i32, %c0_i32_0 : i32, i32
  }
  func.func @transform_9(%arg0: i32) -> (i32, i32) {
    %c0_i32 = arith.constant 0 : i32
    %c0_i32_0 = arith.constant 0 : i32
    return %arg0, %c0_i32 : i32, i32
  }
}

</mosaic_0001>

<bundles_post_ra>
// kernel: tpu_custom_call.1
= control target key start
LH: loop header
LB: loop body
LE: loop exit
PB: predicated region body
PF: predicated region fallthrough
CT: control target
= control target key end

     0   :  { %s2665_s0 = inlined_call_operand.hbm [shape: bf16[256,256], index: 0, kind: input, shape index: {}]   ;;  %s2666_s1 = inlined_call_operand.hbm [shape: bf16[256,128], index: 1, kind: input, shape index: {}]   ;;  %s2667_s2 = inlined_call_operand.vmem [shape: f32[1,128], index: 2, kind: input, shape index: {}]   ;;  %s2668_s3 = inlined_call_operand.hbm [shape: bf16[128,128], index: 3, kind: input, shape index: {}]   ;;  %s2669_s4 = inlined_call_operand.vmem [shape: f32[1,128], index: 4, kind: input, shape index: {}]   ;;  %s2670_s5 = inlined_call_operand.hbm [shape: bf16[128,128], index: 5, kind: input, shape index: {}]   ;;  %s2671_s6 = inlined_call_operand.vmem [shape: f32[1,128], index: 6, kind: input, shape index: {}]   ;;  %s2672_s7 = inlined_call_operand.hbm [shape: bf16[128,256], index: 7, kind: input, shape index: {}]   ;;  %s2673_s8 = inlined_call_operand.vmem [shape: f32[1,256], index: 8, kind: input, shape index: {}]   ;;  %s2674_s9 = inlined_call_operand.hbm [shape: f32[256,256], index: 9, kind: output, shape index: {}]  }
   0x1   :  { %2681 = sst [smem:[#allocation18_spill]] %s2674_s9 }
   0x2   :  { %14 = vsyncpa [#allocation3], 0 }
   0x3   :  { %16 = vsyncpa [#allocation3 + $0x1], 0 }
   0x4   :  { %17 = vsyncpa [#allocation6], 0 }
   0x5   :  { %18 = vsyncpa [#allocation9], 0 }
   0x6   :  { %19 = vsyncpa [#allocation4], 0 }
   0x7   :  { %21 = vsyncpa [#allocation4 + $0x1], 0  ;;  %s2238_s30 = smov 0   ;;  %s2240_s10 = smov 0  }
   0x8   :  { %s2242_s11 = smov 0   ;;  %s2244_s12 = smov 0  }
   0x9 LB: > { %2682 = sst [smem:[#allocation16_spill]] %s2161_s30  ;;  %s2259_s13 = sadd.s32 4294967295, %s2173_s12   ;;  %s2173_s12 = sphi %s2244_s12, %s2706_s12   ;;  %s2169_s11 = sphi %s2242_s11, %s2705_s11   ;;  %s2165_s10 = sphi %s2240_s10, %s2704_s10   ;;  %s2161_s30 = sphi %s2238_s30, %s2703_s30  }
   0xa   : > { %s1512_s14 = sadd.s32 4294967294, %s2173_s12   ;;  %p47_p0 = scmp.ne.s32.totalorder %s2165_s10, %s2161_s30 }
   0xb   : > { %p2675_p1 = scmp.eq.s32.totalorder %s2259_s13, 0  ;;  %p245_p3 = scmp.eq.s32.totalorder %s1512_s14, 1 }
   0xc   : > { %p1513_p5 = scmp.ge.s32.totalorder %s2173_s12, 1  ;;  %p252_p7 = scmp.lt.s32.totalorder %s2173_s12, 3 }
   0xd   : > { %p2268_p4 = por %p2675_p1, %p47_p0  ;;  %p2273_p6 = por %p245_p3, %p47_p0 }
   0xe   : > { %p2278_p8 = pnand %p1513_p5, %p252_p7  ;;  %s2175_s18 = smov [#allocation5]  }
   0xf   : > { %s2683_s15 = scalar_select %p2268_p4, 1, 0 }
  0x10   : > { %s2684_s16 = scalar_select %p2273_p6, 1, 0 }
  0x11   : > { %s2686_s17 = scalar_select %p2278_p8, 1, 0 }
  0x12   : > { %2685 = sst [smem:[#allocation17_spill]] %s2684_s16  ;;  %s264_s19 = sshll.u32 %s2175_s18, 4  ;;  %s2282_s19 = int_to_ptr.vmem [resolvable:$true] %s264_s19 }
  0x13   : > { %p1803_p9 = pneg %p2278_p8  ;;  %s2176_s21 = smov [#allocation8]  }
  0x14   : > { %s296_s22 = sshll.u32 %s2176_s21, 4  ;;  %s2177_s23 = smov [#allocation7]   ;;  %s2293_s22 = int_to_ptr.vmem [resolvable:$true] %s296_s22 }
  0x15   : > { %p2289_p11 = pnand %p1803_p9, %p2675_p1  ;;  %s2295_s24 = sshll.u32 %s2177_s23, 4  ;;  %s281_s24 = int_to_ptr.vmem [resolvable:$true] %s2295_s24 }
  0x16   : > { %s1957_s27 = scalar_lea.hbm %s2666_s1, 2048 }
  0x17   : > { %p1958_p12 = scmp.ne.s32.totalorder %s2666_s1, %s1957_s27  ;;  %p2305_p13 = pneg %p2289_p11 }
  0x18   : > { %p1964_p5 = scmp.lt.u32.totalorder %s1957_s27, %s2666_s1 }
  0x19   : > { %p1960_p0 = pnand %p2305_p13, %p1958_p12 }
  0x1b   : > { %p1961_p3 = pneg %p1960_p0 }
  0x1d   : > { %p1966_p7 = pnand %p1964_p5, %p1961_p3 }
  0x1f   : > { %1969 = shalt.err (!%p1966_p7)
}
  0x20   : > { %s1970_s23 = scalar_lea.vmem %s2282_s19, 2048  ;;  %p1978_p2 = scmp.lt.s32.totalorder %s2282_s19, %s2282_s19 }
  0x21   : > { %p1971_p9 = scmp.ne.s32.totalorder %s2282_s19, %s1970_s23  ;;  %p1979_p6 = scmp.lt.s32.totalorder %s1970_s23, %s1970_s23 }
  0x23   : > { %p1973_p10 = pnand %p1971_p9, %p2305_p13  ;;  %p1980_p12 = por %p1979_p6, %p1978_p2 }
  0x25   : > { %p1974_p1 = pneg %p1973_p10 }
  0x27   : > { %p1981_p0 = pnand %p1980_p12, %p1974_p1 }
  0x29   : > { %1984 = shalt.err (!%p1981_p0)
}
  0x2a   : > { %s2178_s25 = smov 64   ;;  %s2179_s26 = smov 4  }
  0x2b   : > { %1806 = dma.hbm_to_vmem [thread:$0]  (!%p2289_p11), %s2666_s1, 2048, %s2282_s19, [#allocation6], %s2178_s25, %s2178_s25, %s2179_s26  }
  0x2c   : > { %s1985_s21 = scalar_lea.hbm %s2670_s5, 1024 }
  0x2d   : > { %p1986_p1 = scmp.ne.s32.totalorder %s2670_s5, %s1985_s21  ;;  %p1992_p10 = scmp.lt.u32.totalorder %s1985_s21, %s2670_s5 }
  0x2f   : > { %p1988_p2 = pnand %p1986_p1, %p2305_p13 }
  0x31   : > { %p1989_p6 = pneg %p1988_p2 }
  0x33   : > { %p1994_p3 = pnand %p1992_p10, %p1989_p6 }
  0x35   : > { %1997 = shalt.err (!%p1994_p3)
}
  0x36   : > { %s1998_s19 = scalar_lea.vmem %s2293_s22, 1024  ;;  %p2006_p12 = scmp.lt.s32.totalorder %s2293_s22, %s2293_s22 }
  0x37   : > { %p1999_p5 = scmp.ne.s32.totalorder %s2293_s22, %s1998_s19  ;;  %p2007_p0 = scmp.lt.s32.totalorder %s1998_s19, %s1998_s19 }
  0x39   : > { %p2001_p7 = pnand %p1999_p5, %p2305_p13  ;;  %p2008_p1 = por %p2007_p0, %p2006_p12 }
  0x3b   : > { %p2002_p9 = pneg %p2001_p7 }
  0x3d   : > { %p2009_p2 = pnand %p2008_p1, %p2002_p9 }
  0x3f   : > { %2012 = shalt.err (!%p2009_p2)
}
  0x40   : > { %1812 = dma.hbm_to_vmem [thread:$0]  (!%p2289_p11), %s2670_s5, 1024, %s2293_s22, [#allocation9], %s2178_s25, %s2178_s25, %s2179_s26  }
  0x41   : > { %s2013_s28 = scalar_lea.hbm %s2668_s3, 1024 }
  0x42   : > { %p2014_p6 = scmp.ne.s32.totalorder %s2668_s3, %s2013_s28  ;;  %p2020_p5 = scmp.lt.u32.totalorder %s2013_s28, %s2668_s3 }
  0x44   : > { %p2016_p10 = pnand %p2014_p6, %p2305_p13 }
  0x46   : > { %p2017_p3 = pneg %p2016_p10 }
  0x48   : > { %p2022_p7 = pnand %p2020_p5, %p2017_p3 }
  0x4a   : > { %2025 = shalt.err (!%p2022_p7)
}
  0x4b   : > { %s2026_s19 = scalar_lea.vmem %s281_s24, 1024  ;;  %p2034_p1 = scmp.lt.s32.totalorder %s281_s24, %s281_s24 }
  0x4c   : > { %p2027_p9 = scmp.ne.s32.totalorder %s281_s24, %s2026_s19  ;;  %p2035_p2 = scmp.lt.s32.totalorder %s2026_s19, %s2026_s19 }
  0x4e   : > { %p2029_p12 = pnand %p2027_p9, %p2305_p13  ;;  %p2036_p4 = por %p2035_p2, %p2034_p1 }
  0x50   : > { %p2030_p0 = pneg %p2029_p12 }
  0x52   : > { %p2037_p8 = pnand %p2036_p4, %p2030_p0 }
  0x54   : > { %2040 = shalt.err (!%p2037_p8)
}
  0x55   : > { %1809 = dma.hbm_to_vmem [thread:$0]  (!%p2289_p11), %s2668_s3, 1024, %s281_s24, [#allocation6], %s2178_s25, %s2178_s25, %s2179_s26  }
  0x56   : > { %s2180_s30 = smov [#allocation10]   ;;  %s2041_s29 = scalar_lea.hbm %s2672_s7, 2048 }
  0x57   : > { %s312_s16 = sshll.u32 %s2180_s30, 4  ;;  %p2042_p4 = scmp.ne.s32.totalorder %s2672_s7, %s2041_s29  ;;  %s313_s16 = int_to_ptr.vmem [resolvable:$true] %s312_s16 }
  0x58   : > { %p2048_p10 = scmp.lt.u32.totalorder %s2041_s29, %s2672_s7 }
  0x59   : > { %p2044_p8 = pnand %p2042_p4, %p2305_p13 }
  0x5b   : > { %p2045_p6 = pneg %p2044_p8 }
  0x5d   : > { %p2050_p3 = pnand %p2048_p10, %p2045_p6 }
  0x5f   : > { %2053 = shalt.err (!%p2050_p3)
}
  0x60   : > { %s2054_s24 = scalar_lea.vmem %s313_s16, 2048  ;;  %p2062_p12 = scmp.lt.s32.totalorder %s313_s16, %s313_s16 }
  0x61   : > { %p2055_p5 = scmp.ne.s32.totalorder %s313_s16, %s2054_s24  ;;  %p2063_p0 = scmp.lt.s32.totalorder %s2054_s24, %s2054_s24 }
  0x63   : > { %p2057_p7 = pnand %p2055_p5, %p2305_p13  ;;  %p2064_p1 = por %p2063_p0, %p2062_p12 }
  0x65   : > { %p2058_p9 = pneg %p2057_p7 }
  0x67   : > { %p2065_p2 = pnand %p2064_p1, %p2058_p9 }
  0x69   : > { %2068 = shalt.err (!%p2065_p2)
}
  0x6a   : > { %s2181_s25 = smov 128   ;;  %s2182_s14 = smov 8  }
  0x6b   : > { %1815 = dma.hbm_to_vmem [thread:$0]  (!%p2289_p11), %s2672_s7, 2048, %s313_s16, [#allocation9], %s2181_s25, %s2181_s25, %s2182_s14  }
  0x6c   : > { %s2399_s9 = sadd.s32 1, %s2173_s12   ;;  %s34_s27 = sadd.s32 1, %s2169_s11 }
  0x6d   : > { %s31_s30 = ssub.s32 %s2173_s12, %s2399_s9  ;;  %p41_p4 = scmp.ne.s32.totalorder %s2169_s11, %s2165_s10 }
  0x6e   : > { %p32_p13 = scmp.eq.s32.totalorder %s31_s30, 0  ;;  %p42_p8 = scmp.eq.s32.totalorder %s2173_s12, 0 }
  0x6f   : > { %p2689_p10 = scmp.eq.s32.totalorder %s2259_s13, 1  ;;  %p1828_p5 = scmp.lt.s32.totalorder %s2173_s12, 2 }
  0x70   : > { %s2408_s28 = scalar_select %p32_p13, %s2169_s11, %s34_s27  }
  0x71   : > { %p43_p6 = por %p42_p8, %p41_p4  ;;  %p2412_p3 = por %p2689_p10, %p41_p4 }
  0x72   : > { %s329_s29 = sand.u32 1, %s2169_s11   ;;  %s1604_s16 = sshll.u32 %s2173_s12, 11 }
  0x73   : > { %s1519_s18 = sshll.u32 %s329_s29, 7  ;;  %s2422_s19 = scalar_lea.hbm %s2665_s0, %s1604_s16 }
  0x74   : > { %s333_s24 = scalar_lea.vmem [#allocation2], %s1519_s18  ;;  %p2426_p11 = pnand %p1828_p5, %p43_p6 }
  0x75   : > { %s341_s26 = sshll.u32 %s333_s24, 4  ;;  %s2430_s30 = scalar_lea.sflag [#allocation3], %s329_s29  ;;  %s2424_s26 = int_to_ptr.vmem [resolvable:$true] %s341_s26 }
  0x76   : > { %s2069_s27 = scalar_lea.hbm %s2422_s19, 2048  ;;  %p2071_p9 = pneg %p2426_p11 }
  0x77   : > { %p2070_p7 = scmp.ne.s32.totalorder %s2422_s19, %s2069_s27  ;;  %s2074_s21 = scalar_lea.hbm %s2665_s0, 4096 }
  0x78   : > { %p2075_p1 = scmp.lt.u32.totalorder %s2422_s19, %s2665_s0  ;;  %p2076_p2 = scmp.lt.u32.totalorder %s2074_s21, %s2069_s27 }
  0x79   : > { %p2072_p12 = pnand %p2071_p9, %p2070_p7  ;;  %p2078_p4 = scmp.lt.u32.totalorder %s2069_s27, %s2422_s19 }
  0x7a   : > { %p2077_p13 = por %p2076_p2, %p2075_p1 }
  0x7b   : > { %p2073_p0 = pneg %p2072_p12 }
  0x7c   : > { %p2079_p8 = por %p2078_p4, %p2077_p13 }
  0x7e   : > { %p2080_p6 = pnand %p2079_p8, %p2073_p0 }
  0x80   : > { %2083 = shalt.err (!%p2080_p6)
}
  0x81   : > { %s2084_s29 = scalar_lea.vmem %s2424_s26, 2048  ;;  %s2183_s18 = smov [#allocation2]  }
  0x82   : > { %p2085_p10 = scmp.ne.s32.totalorder %s2424_s26, %s2084_s29  ;;  %s2089_s16 = sshll.u32 %s2183_s18, 4  ;;  %s2090_s16 = int_to_ptr.vmem [resolvable:$false] %s2089_s16 }
  0x83   : > { %s2091_s23 = scalar_lea.vmem %s2090_s16, 4096  ;;  %p2092_p12 = scmp.lt.s32.totalorder %s2424_s26, %s2090_s16 }
  0x84   : > { %p2087_p5 = pnand %p2085_p10, %p2071_p9  ;;  %p2093_p1 = scmp.lt.s32.totalorder %s2091_s23, %s2084_s29 }
  0x86   : > { %p2088_p7 = pneg %p2087_p5  ;;  %p2094_p2 = por %p2093_p1, %p2092_p12 }
  0x88   : > { %p2095_p13 = pnand %p2094_p2, %p2088_p7 }
  0x8a   : > { %2098 = shalt.err (!%p2095_p13)
}
  0x8b   : > { %1819 = dma.hbm_to_vmem [thread:$0]  (!%p2426_p11), %s2422_s19, 2048, %s2424_s26, %s2430_s30, %s2181_s25, %s2181_s25, %s2182_s14  }
  0x8c   : > { %p2692_p9 = scmp.ne.s32.totalorder %s2686_s17, 0 }
  0x8d   : > { %s2464_s27 = sand.u32 (!%p2692_p9), 1, %s2165_s10   ;;  %p2693_p0 = scmp.ne.s32.totalorder (!%p2692_p9), %s2683_s15, 0 }
  0x8e   : > { %353 = sbr.rel (%p2692_p9) target bundleno = 1150 (0x47e), region = 56  ;;  %s1524_s21 = sshll.u32 (!%p2692_p9), %s2464_s27, 7 }
  0x8f   : > { %s356_s24 = scalar_lea.sflag (!%p2692_p9), [#allocation3], %s2464_s27  ;;  %s2468_s29 = scalar_lea.vmem (!%p2692_p9), [#allocation2], %s1524_s21 }
  0x95   : > { %2144 = dma.done.wait (%p2693_p0), %s356_s24, 2048  }
  0x96   : > { %2146 = vsyncadd (%p2693_p0), %s356_s24, 4294965248  ;;  %p2694_p11 = scmp.eq.s32.totalorder %s2259_s13, 0 }
  0x98   : > { %2148 = dma.done.wait (%p2694_p11), [#allocation6], 3072   ;;  %p2695_p4 = pmov %p2694_p11 }
  0x9a   : > { %2150 = vsyncadd (%p2695_p4), [#allocation6], 4294964224  ;;  %p2696_p8 = pmov %p2695_p4 }
  0x9b   : > { %p2697_p6 = pmov %p2695_p4 }
  0x9c   : > { %2152 = dma.done.wait (%p2696_p8), [#allocation9], 3072  }
  0x9d   : > { %2154 = vsyncadd (%p2697_p6), [#allocation9], 4294964224  ;;  %v1877_v0 = vld [vmem:[#allocation5 + $0x40] sm:$0xff]   ;;  %v1879_v2 = vld [vmem:[#allocation5 + $0x48] sm:$0xff]   ;;  %s1529_s18 = sshll.u32 %s2464_s27, 8  ;;  %s1606_s23 = sshll.u32 %s2259_s13, 12 }
  0x9e   : > { %v1878_v1 = vld [vmem:[#allocation5] sm:$0xff]   ;;  %1607 = vmatprep.subr.bf16.mxu0 %v1877_v0  ;;  %1767 = vmatprep.subr.bf16.mxu1 %v1877_v0  ;;  %v1880_v3 = vld [vmem:[#allocation5 + $0x8] sm:$0xff]   ;;  %v1881_v4 = vld [vmem:[#allocation5 + $0x50] sm:$0xff]   ;;  %s2550_s16 = scalar_lea.vmem [#allocation11], %s1529_s18  ;;  %s2698_s15 = sld [smem:[#allocation18_spill]] }
  0x9f   : > { %1608 = vmatpush3.bf16.msra.mxu0 %v1878_v1  ;;  %1775 = vmatpush3.bf16.msra.mxu1 %v1878_v1  ;;  %v1882_v5 = vld [vmem:[#allocation5 + $0x10] sm:$0xff]   ;;  %v1883_v6 = vld [vmem:[#allocation5 + $0x58] sm:$0xff]   ;;  %v1885_v8 = vld [vmem:[#allocation5 + $0x60] sm:$0xff]   ;;  %s1401_s21 = sshll.u32 %s2550_s16, 4  ;;  %s1387_s13 = scalar_lea.sflag [#allocation4], %s2464_s27  ;;  %s2617_s21 = int_to_ptr.vmem [resolvable:$true] %s1401_s21 }
  0xa0   : > { %1609 = vmatprep.subr.bf16.mxu0 %v1879_v2  ;;  %1768 = vmatprep.subr.bf16.mxu1 %v1879_v2  ;;  %v1884_v7 = vld [vmem:[#allocation5 + $0x18] sm:$0xff]   ;;  %v1886_v9 = vld [vmem:[#allocation5 + $0x20] sm:$0xff]   ;;  %v1887_v10 = vld [vmem:[#allocation5 + $0x68] sm:$0xff]   ;;  %s2099_s25 = scalar_lea.vmem %s2617_s21, 4096  ;;  %s2185_s14 = smov [#allocation11]  }
  0xa1   : > { %v1895_v11 = vld [vmem:[%s2468_s29 + $0x4] ss:$8 sps:$4 sm:$0xff]   ;;  %v1889_v13 = vld [vmem:[#allocation5 + $0x70] sm:$0xff]   ;;  %v1891_v16 = vld [vmem:[#allocation5 + $0x78] sm:$0xff]   ;;  %p2100_p10 = scmp.ne.s32.totalorder %s2617_s21, %s2099_s25  ;;  %s2103_s19 = sshll.u32 %s2185_s14, 4  ;;  %s2104_s19 = int_to_ptr.vmem [resolvable:$false] %s2103_s19 }
  0xa2   : > { %v1888_v12 = vld [vmem:[#allocation5 + $0x28] sm:$0xff]   ;;  %676 = vmatprep.mubr.bf16.mxu0 %v1895_v11  ;;  %v1890_v15 = vld [vmem:[#allocation5 + $0x30] sm:$0xff]   ;;  %v1892_v17 = vld [vmem:[#allocation5 + $0x38] sm:$0xff]   ;;  %s2105_s26 = scalar_lea.vmem %s2104_s19, 8192  ;;  %p2106_p12 = scmp.lt.s32.totalorder %s2617_s21, %s2104_s19 }
  0xa3   : > { %1610 = vmatpush3.bf16.msra.mxu0 %v1880_v3  ;;  %1776 = vmatpush3.bf16.msra.mxu1 %v1880_v3  ;;  %v1904_v14 = vld [vmem:[%s2468_s29 + $0x44] ss:$8 sps:$4 sm:$0xff]   ;;  %v1893_v18 = vld [vmem:[%s2468_s29] ss:$8 sps:$4 sm:$0xff]   ;;  %v1896_v19 = vld [vmem:[%s2468_s29 + $0x14] ss:$8 sps:$4 sm:$0xff]   ;;  %p2101_p5 = pnand %p2100_p10, %p2412_p3  ;;  %p2107_p1 = scmp.lt.s32.totalorder %s2105_s26, %s2099_s25 }
  0xa4   : > { %1611 = vmatprep.subr.bf16.mxu0 %v1881_v4  ;;  %1769 = vmatprep.subr.bf16.mxu1 %v1881_v4  ;;  %v1902_v20 = vld [vmem:[%s2468_s29 + $0x40] ss:$8 sps:$4 sm:$0xff]   ;;  %v1908_v22 = vld [vmem:[%s2468_s29 + $0x54] ss:$8 sps:$4 sm:$0xff]   ;;  %v1898_v25 = vld [vmem:[%s2468_s29 + $0x10] ss:$8 sps:$4 sm:$0xff]   ;;  %s2615_s17 = scalar_lea.hbm %s2698_s15, %s1606_s23 }
  0xa5   : > { %708 = vmatprep.mubr.bf16.mxu1 %v1904_v14  ;;  %v1917_v21 = vld [vmem:[#allocation7] sm:$0xff]   ;;  %v1918_v23 = vld [vmem:[#allocation7 + $0x8] sm:$0xff]   ;;  %v1919_v24 = vld [vmem:[#allocation7 + $0x10] sm:$0xff]   ;;  %p2102_p7 = pneg %p2101_p5  ;;  %p2108_p2 = por %p2107_p1, %p2106_p12 }
  0xa6   : > { %v1899_v26 = vld [vmem:[%s2468_s29 + $0x24] ss:$8 sps:$4 sm:$0xff]   ;;  %v1910_v27 = vld [vmem:[%s2468_s29 + $0x50] ss:$8 sps:$4 sm:$0xff]   ;;  %v1901_v30 = vld [vmem:[%s2468_s29 + $0x20] ss:$8 sps:$4 sm:$0xff]  }
  0xa7   : > { %1612 = vmatpush3.bf16.msra.mxu0 %v1882_v5  ;;  %1777 = vmatpush3.bf16.msra.mxu1 %v1882_v5  ;;  %v1911_v28 = vld [vmem:[%s2468_s29 + $0x64] ss:$8 sps:$4 sm:$0xff]   ;;  %v1920_v29 = vld [vmem:[#allocation7 + $0x18] sm:$0xff]   ;;  %v1913_v32 = vld [vmem:[%s2468_s29 + $0x60] ss:$8 sps:$4 sm:$0xff]   ;;  %p2109_p13 = pnand %p2108_p2, %p2102_p7 }
  0xa8   : > { %1613 = vmatprep.subr.bf16.mxu0 %v1883_v6  ;;  %1770 = vmatprep.subr.bf16.mxu1 %v1883_v6  ;;  %v1905_v31 = vld [vmem:[%s2468_s29 + $0x34] ss:$8 sps:$4 sm:$0xff]   ;;  %v1907_v34 = vld [vmem:[%s2468_s29 + $0x30] ss:$8 sps:$4 sm:$0xff]   ;;  %v1921_v36 = vld [vmem:[#allocation7 + $0x20] sm:$0xff]  }
  0xa9   : > { %v1914_v33 = vld [vmem:[%s2468_s29 + $0x74] ss:$8 sps:$4 sm:$0xff]   ;;  %v1916_v35 = vld [vmem:[%s2468_s29 + $0x70] ss:$8 sps:$4 sm:$0xff]   ;;  %v1922_v37 = vld [vmem:[#allocation7 + $0x28] sm:$0xff]  }
  0xaa   : > { %v1923_v38 = vld [vmem:[#allocation7 + $0x30] sm:$0xff]   ;;  %v1924_v39 = vld [vmem:[#allocation7 + $0x38] sm:$0xff]   ;;  %v2498_v40 = vld [vmem:[#allocation8] sm:$0xff]  }
  0xab   : > { %1614 = vmatpush3.bf16.msra.mxu0 %v1884_v7  ;;  %1778 = vmatpush3.bf16.msra.mxu1 %v1884_v7  ;;  %v2504_v42 = vld [vmem:[%s2667_s2] ss:$0 sm:$0xff] }
  0xac   : > { %1615 = vmatprep.subr.bf16.mxu0 %v1885_v8  ;;  %1771 = vmatprep.subr.bf16.mxu1 %v1885_v8 }
  0xaf   : > { %1616 = vmatpush3.bf16.msra.mxu0 %v1886_v9  ;;  %1779 = vmatpush3.bf16.msra.mxu1 %v1886_v9 }
  0xb0   : > { %1617 = vmatprep.subr.bf16.mxu0 %v1887_v10  ;;  %1772 = vmatprep.subr.bf16.mxu1 %v1887_v10 }
  0xb3   : > { %1618 = vmatpush3.bf16.msra.mxu0 %v1888_v12  ;;  %1780 = vmatpush3.bf16.msra.mxu1 %v1888_v12 }
  0xb4   : > { %1619 = vmatprep.subr.bf16.mxu0 %v1889_v13  ;;  %1773 = vmatprep.subr.bf16.mxu1 %v1889_v13 }
  0xb7   : > { %1620 = vmatpush3.bf16.msra.mxu0 %v1890_v15  ;;  %1781 = vmatpush3.bf16.msra.mxu1 %v1890_v15 }
  0xb8   : > { %1621 = vmatprep.subr.bf16.mxu0 %v1891_v16  ;;  %1774 = vmatprep.subr.bf16.mxu1 %v1891_v16 }
  0xbb   : > { %1622 = vmatpush3.bf16.msra.mxu0 %v1892_v17  ;;  %1782 = vmatpush3.bf16.msra.mxu1 %v1892_v17 }
  0xbc   : > { %1703 = vmatprep.subr.bf16.mxu1 %v1917_v21 }
  0xbe   : > { %677 = vmatmul.mubr.bf16.vlgmr.msra.gmra.mrb[0].mxu0 %v1893_v18  ;;  %709 = vmatmul.mubr.bf16.vlgmr.msra.gmra.mrb[0].mxu1 %v1902_v20 }
  0xbf   : > { %684 = vmatprep.mubr.bf16.mxu0 %v1896_v19  ;;  %716 = vmatprep.mubr.bf16.mxu1 %v1908_v22 }
  0xc0   : > { %1704 = vmatpush3.bf16.msra.mxu1 %v1917_v21 }
  0xc1   : > { %1705 = vmatprep.subr.bf16.mxu1 %v1918_v23 }
  0xc4   : > { %1706 = vmatpush3.bf16.msra.mxu1 %v1918_v23 }
  0xc5   : > { %1707 = vmatprep.subr.bf16.mxu1 %v1919_v24 }
  0xc6   : > { %685 = vmatmul.mubr.bf16.gmra.mrb[4].mxu0 %v1898_v25  ;;  %717 = vmatmul.mubr.bf16.gmra.mrb[4].mxu1 %v1910_v27  ;;  %v1926_v27 = vld [vmem:[#allocation8 + $0x8] sm:$0xff]  }
  0xc7   : > { %692 = vmatprep.mubr.bf16.mxu0 %v1899_v26  ;;  %724 = vmatprep.mubr.bf16.mxu1 %v1911_v28 }
  0xc8   : > { %1708 = vmatpush3.bf16.msra.mxu1 %v1919_v24 }
  0xc9   : > { %1709 = vmatprep.subr.bf16.mxu1 %v1920_v29 }
  0xcc   : > { %1710 = vmatpush3.bf16.msra.mxu1 %v1920_v29 }
  0xcd   : > { %1711 = vmatprep.subr.bf16.mxu1 %v1921_v36 }
  0xce   : > { %693 = vmatmul.mubr.bf16.gmra.mrb[8].mxu0 %v1901_v30  ;;  %725 = vmatmul.mubr.bf16.gmra.mrb[8].mxu1 %v1913_v32 }
  0xcf   : > { %700 = vmatprep.mubr.bf16.mxu0 %v1905_v31  ;;  %732 = vmatprep.mubr.bf16.mxu1 %v1914_v33 }
  0xd0   : > { %1712 = vmatpush3.bf16.msra.mxu1 %v1921_v36 }
  0xd1   : > { %1713 = vmatprep.subr.bf16.mxu1 %v1922_v37 }
  0xd4   : > { %1714 = vmatpush3.bf16.msra.mxu1 %v1922_v37 }
  0xd5   : > { %1715 = vmatprep.subr.bf16.mxu1 %v1923_v38 }
  0xd6   : > { %701 = vmatmul.mubr.bf16.gmra.mrb[12].mxu0 %v1907_v34  ;;  %733 = vmatmul.mubr.bf16.gmra.mrb[12].mxu1 %v1916_v35 }
  0xd8   : > { %1716 = vmatpush3.bf16.msra.mxu1 %v1923_v38  ;;  %v1927_v38 = vld [vmem:[#allocation8 + $0x10] sm:$0xff]  }
  0xd9   : > { %1717 = vmatprep.subr.bf16.mxu1 %v1924_v39 }
  0xdc   : > { %1718 = vmatpush3.bf16.msra.mxu1 %v1924_v39 }
  0xdd   : > { %1735 = vmatprep.subr.bf16.mxu1 %v2498_v40 }
 0x191   : > { %v1623_v41 = vpop.f32.mrb[0].mxu0  ;;  %v1647_v44 = vpop.f32.mrb[0].mxu1 }
 0x192   : > { %v1624_v43 = vpop.f32.mrb[1].mxu0  ;;  %v1648_v47 = vpop.f32.mrb[1].mxu1 }
 0x193   : > { %v1625_v45 = vadd.f32 %v1624_v43, %v1623_v41  ;;  %v1626_v46 = vpop.f32.mrb[2].mxu0  ;;  %v1649_v49 = vadd.f32 %v1648_v47, %v1647_v44  ;;  %v1650_v50 = vpop.f32.mrb[2].mxu1 }
 0x194   : > { %v1627_v48 = vpop.f32.mrb[3].mxu0  ;;  %v1651_v53 = vpop.f32.mrb[3].mxu1 }
 0x195   : > { %v679_v51 = vadd.f32 %v1625_v45, %v2504_v42  ;;  %v1628_v52 = vadd.f32 %v1627_v48, %v1626_v46  ;;  %v711_v54 = vadd.f32 %v1649_v49, %v2504_v42  ;;  %v1652_v55 = vadd.f32 %v1651_v53, %v1650_v50 }
 0x197   : > { %v682_v56 = vadd.f32 %v1628_v52, %v2504_v42  ;;  %v749_v57 = vmax.f32 %v711_v54, 0.0  ;;  %v714_v58 = vadd.f32 %v1652_v55, %v2504_v42  ;;  %v741_v59 = vmax.f32 %v679_v51, 0.0 }
 0x199   : > { %v742_v60 = vmax.f32 %v682_v56, 0.0  ;;  %v1629_v61 = vpop.f32.mrb[4].mxu0  ;;  %v750_v63 = vmax.f32 %v714_v58, 0.0  ;;  %v1653_v0 = vpop.f32.mrb[4].mxu1 }
 0x19a   : > { %v1630_v62 = vpop.f32.mrb[5].mxu0  ;;  %v1654_v4 = vpop.f32.mrb[5].mxu1 }
 0x19b   : > { %v1631_v1 = vadd.f32 %v1630_v62, %v1629_v61  ;;  %v1632_v2 = vpop.f32.mrb[6].mxu0  ;;  %v757_v3 = vpack.c.bf16 %v742_v60, %v741_v59  ;;  %v1655_v6 = vadd.f32 %v1654_v4, %v1653_v0  ;;  %v1656_v7 = vpop.f32.mrb[6].mxu1  ;;  %v2510_v8 = vpack.c.bf16 %v750_v63, %v749_v57  ;;  %v1929_v63 = vld [vmem:[#allocation8 + $0x20] sm:$0xff]  }
 0x19c   : > { %v1633_v5 = vpop.f32.mrb[7].mxu0  ;;  %v1657_v11 = vpop.f32.mrb[7].mxu1 }
 0x19d   : > { %v687_v9 = vadd.f32 %v1631_v1, %v2504_v42  ;;  %v1634_v10 = vadd.f32 %v1633_v5, %v1632_v2  ;;  %1719 = vmatprep.mubr.bf16.mxu1 %v757_v3  ;;  %v719_v12 = vadd.f32 %v1655_v6, %v2504_v42  ;;  %v1658_v13 = vadd.f32 %v1657_v11, %v1656_v7  ;;  %v1930_v6 = vld [vmem:[#allocation8 + $0x28] sm:$0xff]  }
 0x19e   : > { %v1935_v11 = vld [vmem:[#allocation10 + $0x4] ss:$8 sps:$4 sm:$0xff]  }
 0x19f   : > { %v690_v14 = vadd.f32 %v1634_v10, %v2504_v42  ;;  %v751_v15 = vmax.f32 %v719_v12, 0.0  ;;  %v722_v16 = vadd.f32 %v1658_v13, %v2504_v42  ;;  %v743_v17 = vmax.f32 %v687_v9, 0.0  ;;  %v1931_v9 = vld [vmem:[#allocation8 + $0x30] sm:$0xff]   ;;  %v1933_v10 = vld [vmem:[#allocation10] ss:$8 sps:$4 sm:$0xff]   ;;  %1241 = vmatprep.subr.bf16.mxu0 %v1935_v11 }
 0x1a0   : > { %v1938_v12 = vld [vmem:[#allocation10 + $0x14] ss:$8 sps:$4 sm:$0xff]   ;;  %1242 = vmatpush1.bf16.msra.mxu0 %v1933_v10  ;;  %v1936_v13 = vld [vmem:[#allocation10 + $0x10] ss:$8 sps:$4 sm:$0xff]  }
 0x1a1   : > { %v744_v18 = vmax.f32 %v690_v14, 0.0  ;;  %v1635_v19 = vpop.f32.mrb[8].mxu0  ;;  %v752_v21 = vmax.f32 %v722_v16, 0.0  ;;  %v1659_v22 = vpop.f32.mrb[8].mxu1  ;;  %1243 = vmatprep.subr.bf16.mxu0 %v1938_v12  ;;  %v1939_v14 = vld [vmem:[#allocation10 + $0x20] ss:$8 sps:$4 sm:$0xff]  }
 0x1a2   : > { %v1636_v20 = vpop.f32.mrb[9].mxu0  ;;  %v1660_v26 = vpop.f32.mrb[9].mxu1  ;;  %v1942_v16 = vld [vmem:[#allocation10 + $0x30] ss:$8 sps:$4 sm:$0xff]  }
 0x1a3   : > { %v758_v23 = vpack.c.bf16 %v744_v18, %v743_v17  ;;  %v1637_v24 = vadd.f32 %v1636_v20, %v1635_v19  ;;  %v1638_v25 = vpop.f32.mrb[10].mxu0  ;;  %v1661_v29 = vadd.f32 %v1660_v26, %v1659_v22  ;;  %v1662_v30 = vpop.f32.mrb[10].mxu1  ;;  %v762_v31 = vpack.c.bf16 %v752_v21, %v751_v15  ;;  %v1944_v15 = vld [vmem:[#allocation10 + $0x34] ss:$8 sps:$4 sm:$0xff]   ;;  %v1947_v17 = vld [vmem:[#allocation10 + $0x44] ss:$8 sps:$4 sm:$0xff]  }
 0x1a4   : > { %v1639_v28 = vpop.f32.mrb[11].mxu0  ;;  %v1663_v34 = vpop.f32.mrb[11].mxu1  ;;  %1244 = vmatpush1.bf16.msra.mxu0 %v1936_v13  ;;  %v1945_v18 = vld [vmem:[#allocation10 + $0x40] ss:$8 sps:$4 sm:$0xff]   ;;  %v1950_v19 = vld [vmem:[#allocation10 + $0x54] ss:$8 sps:$4 sm:$0xff]  }
 0x1a5   : > { %v695_v32 = vadd.f32 %v1637_v24, %v2504_v42  ;;  %v1640_v33 = vadd.f32 %v1639_v28, %v1638_v25  ;;  %1720 = vmatmul.mubr.bf16.vlgmr.msra.gmra.mrb[16].mxu1 %v758_v23  ;;  %v727_v35 = vadd.f32 %v1661_v29, %v2504_v42  ;;  %v1664_v36 = vadd.f32 %v1663_v34, %v1662_v30  ;;  %v1948_v20 = vld [vmem:[#allocation10 + $0x50] ss:$8 sps:$4 sm:$0xff]   ;;  %v1563_v22 = vld [vmem:[%s2669_s4] ss:$0 sm:$0xff] }
 0x1a6   : > { %1736 = vmatpush3.bf16.msra.mxu1 %v2498_v40  ;;  %v1928_v40 = vld [vmem:[#allocation8 + $0x18] sm:$0xff]  }
 0x1a7   : > { %v698_v37 = vadd.f32 %v1640_v33, %v2504_v42  ;;  %1737 = vmatprep.subr.bf16.mxu1 %v1926_v27  ;;  %v753_v39 = vmax.f32 %v727_v35, 0.0  ;;  %v730_v41 = vadd.f32 %v1664_v36, %v2504_v42  ;;  %v745_v43 = vmax.f32 %v695_v32, 0.0 }
 0x1a9   : > { %v746_v44 = vmax.f32 %v698_v37, 0.0  ;;  %v1641_v45 = vpop.f32.mrb[12].mxu0  ;;  %v754_v47 = vmax.f32 %v730_v41, 0.0  ;;  %v1665_v48 = vpop.f32.mrb[12].mxu1 }
 0x1aa   : > { %v1642_v46 = vpop.f32.mrb[13].mxu0  ;;  %1738 = vmatpush3.bf16.msra.mxu1 %v1926_v27  ;;  %v1666_v52 = vpop.f32.mrb[13].mxu1 }
 0x1ab   : > { %v1643_v49 = vadd.f32 %v1642_v46, %v1641_v45  ;;  %v1644_v50 = vpop.f32.mrb[14].mxu0  ;;  %v759_v51 = vpack.c.bf16 %v746_v44, %v745_v43  ;;  %1739 = vmatprep.subr.bf16.mxu1 %v1927_v38  ;;  %v1667_v54 = vadd.f32 %v1666_v52, %v1665_v48  ;;  %v1668_v55 = vpop.f32.mrb[14].mxu1  ;;  %v763_v56 = vpack.c.bf16 %v754_v47, %v753_v39 }
 0x1ac   : > { %v1645_v53 = vpop.f32.mrb[15].mxu0  ;;  %v1669_v59 = vpop.f32.mrb[15].mxu1 }
 0x1ad   : > { %v703_v57 = vadd.f32 %v1643_v49, %v2504_v42  ;;  %v1646_v58 = vadd.f32 %v1645_v53, %v1644_v50  ;;  %1723 = vmatprep.mubr.bf16.mxu1 %v759_v51  ;;  %v735_v60 = vadd.f32 %v1667_v54, %v2504_v42  ;;  %v1670_v61 = vadd.f32 %v1669_v59, %v1668_v55 }
 0x1ae   : > { %1740 = vmatpush3.bf16.msra.mxu1 %v1927_v38 }
 0x1af   : > { %v706_v62 = vadd.f32 %v1646_v58, %v2504_v42  ;;  %1741 = vmatprep.subr.bf16.mxu1 %v1928_v40  ;;  %v755_v0 = vmax.f32 %v735_v60, 0.0  ;;  %v738_v1 = vadd.f32 %v1670_v61, %v2504_v42  ;;  %v747_v2 = vmax.f32 %v703_v57, 0.0  ;;  %v1932_v42 = vld [vmem:[#allocation8 + $0x38] sm:$0xff]  }
 0x1b1   : > { %v748_v3 = vmax.f32 %v706_v62, 0.0  ;;  %v756_v4 = vmax.f32 %v738_v1, 0.0  ;;  %v1956_v1 = vld [vmem:[#allocation10 + $0x74] ss:$8 sps:$4 sm:$0xff]  }
 0x1b2   : > { %1742 = vmatpush3.bf16.msra.mxu1 %v1928_v40 }
 0x1b3   : > { %v760_v5 = vpack.c.bf16 %v748_v3, %v747_v2  ;;  %1743 = vmatprep.subr.bf16.mxu1 %v1929_v63  ;;  %v764_v7 = vpack.c.bf16 %v756_v4, %v755_v0  ;;  %v1951_v0 = vld [vmem:[#allocation10 + $0x60] ss:$8 sps:$4 sm:$0xff]   ;;  %v1954_v2 = vld [vmem:[#allocation10 + $0x70] ss:$8 sps:$4 sm:$0xff]   ;;  %v2184_v3 = vmov 0  }
 0x1b4   : > { %1273 = vmatprep.mubr.bf16.mxu0 %v2184_v3  ;;  %v1572_v4 = vld [vmem:[%s2671_s6] ss:$0 sm:$0xff] }
 0x1b5   : > { %1724 = vmatmul.mubr.bf16.gmra.mrb[20].mxu1 %v760_v5 }
 0x1b6   : > { %1727 = vmatprep.mubr.bf16.mxu1 %v2510_v8  ;;  %1744 = vmatpush3.bf16.msra.mxu1 %v1929_v63  ;;  %v1941_v8 = vld [vmem:[#allocation10 + $0x24] ss:$8 sps:$4 sm:$0xff]  }
 0x1b7   : > { %1745 = vmatprep.subr.bf16.mxu1 %v1930_v6  ;;  %1245 = vmatprep.subr.bf16.mxu0 %v1941_v8  ;;  %v1953_v63 = vld [vmem:[#allocation10 + $0x64] ss:$8 sps:$4 sm:$0xff]  }
 0x1b8   : > { %1246 = vmatpush1.bf16.msra.mxu0 %v1939_v14 }
 0x1b9   : > { %1247 = vmatprep.subr.bf16.mxu0 %v1944_v15 }
 0x1ba   : > { %1746 = vmatpush3.bf16.msra.mxu1 %v1930_v6 }
 0x1bb   : > { %1747 = vmatprep.subr.bf16.mxu1 %v1931_v9 }
 0x1bc   : > { %1248 = vmatpush1.bf16.msra.mxu0 %v1942_v16 }
 0x1bd   : > { %1728 = vmatmul.mubr.bf16.gmra.mrb[24].mxu1 %v762_v31  ;;  %1249 = vmatprep.subr.bf16.mxu0 %v1947_v17 }
 0x1be   : > { %1731 = vmatprep.mubr.bf16.mxu1 %v763_v56  ;;  %1748 = vmatpush3.bf16.msra.mxu1 %v1931_v9 }
 0x1bf   : > { %1749 = vmatprep.subr.bf16.mxu1 %v1932_v42 }
 0x1c0   : > { %1250 = vmatpush1.bf16.msra.mxu0 %v1945_v18 }
 0x1c1   : > { %1251 = vmatprep.subr.bf16.mxu0 %v1950_v19 }
 0x1c2   : > { %1750 = vmatpush3.bf16.msra.mxu1 %v1932_v42 }
 0x1c4   : > { %1252 = vmatpush1.bf16.msra.mxu0 %v1948_v20 }
 0x1c5   : > { %1732 = vmatmul.mubr.bf16.gmra.mrb[28].mxu1 %v764_v7  ;;  %1253 = vmatprep.subr.bf16.mxu0 %v1953_v63 }
 0x1c8   : > { %1254 = vmatpush1.bf16.msra.mxu0 %v1951_v0  ;;  %v1149_v0 = vld [vmem:[%s2673_s8] sm:$0x3] }
 0x1c9   : > { %1255 = vmatprep.subr.bf16.mxu0 %v1956_v1 }
 0x1cc   : > { %1256 = vmatpush1.bf16.msra.mxu0 %v1954_v2 }
 0x278   : > { %v1721_v21 = vpop.f32.mrb[16].mxu1 }
 0x279   : > { %v870_v23 = vpop.f32.mrb[17].mxu1  ;;  %v879_v25 = vadd.f32 %v1721_v21, %v1563_v22 }
 0x27a   : > { %v1722_v24 = vpop.f32.mrb[18].mxu1  ;;  %v871_v28 = vadd.f32 %v1563_v22, %v870_v23 }
 0x27b   : > { %v882_v26 = vadd.f32 %v1722_v24, %v1563_v22  ;;  %v873_v27 = vpop.f32.mrb[19].mxu1 }
 0x27c   : > { %v874_v29 = vadd.f32 %v1563_v22, %v873_v27 }
 0x27d   : > { %v934_v30 = vpack.c.bf16 %v882_v26, %v879_v25 }
 0x27e   : > { %v933_v31 = vpack.c.bf16 %v874_v29, %v871_v28 }
 0x280   : > { %1751 = vmatprep.mubr.bf16.mxu1 %v933_v31 }
 0x281   : > { %1752 = vmatmul.mubr.bf16.vlgmr.msra.gmra.mrb[32].mxu1 %v934_v30 }
 0x288   : > { %v1725_v32 = vpop.f32.mrb[20].mxu1 }
 0x289   : > { %v886_v33 = vpop.f32.mrb[21].mxu1  ;;  %v895_v35 = vadd.f32 %v1725_v32, %v1563_v22 }
 0x28a   : > { %v1726_v34 = vpop.f32.mrb[22].mxu1  ;;  %v887_v38 = vadd.f32 %v1563_v22, %v886_v33 }
 0x28b   : > { %v898_v36 = vadd.f32 %v1726_v34, %v1563_v22  ;;  %v889_v37 = vpop.f32.mrb[23].mxu1 }
 0x28c   : > { %v890_v39 = vadd.f32 %v1563_v22, %v889_v37 }
 0x28d   : > { %v936_v41 = vpack.c.bf16 %v898_v36, %v895_v35 }
 0x28e   : > { %v935_v43 = vpack.c.bf16 %v890_v39, %v887_v38 }
 0x290   : > { %v1729_v44 = vpop.f32.mrb[24].mxu1  ;;  %1755 = vmatprep.mubr.bf16.mxu1 %v935_v43 }
 0x291   : > { %v911_v45 = vadd.f32 %v1729_v44, %v1563_v22  ;;  %v902_v46 = vpop.f32.mrb[25].mxu1  ;;  %1756 = vmatmul.mubr.bf16.gmra.mrb[36].mxu1 %v936_v41 }
 0x292   : > { %v903_v47 = vadd.f32 %v1563_v22, %v902_v46  ;;  %v1730_v48 = vpop.f32.mrb[26].mxu1 }
 0x293   : > { %v914_v49 = vadd.f32 %v1730_v48, %v1563_v22  ;;  %v905_v50 = vpop.f32.mrb[27].mxu1 }
 0x294   : > { %v906_v51 = vadd.f32 %v1563_v22, %v905_v50 }
 0x295   : > { %v938_v52 = vpack.c.bf16 %v914_v49, %v911_v45 }
 0x296   : > { %v937_v40 = vpack.c.bf16 %v906_v51, %v903_v47 }
 0x298   : > { %1759 = vmatprep.mubr.bf16.mxu1 %v937_v40  ;;  %v1733_v53 = vpop.f32.mrb[28].mxu1 }
 0x299   : > { %1760 = vmatmul.mubr.bf16.gmra.mrb[40].mxu1 %v938_v52  ;;  %v927_v54 = vadd.f32 %v1733_v53, %v1563_v22  ;;  %v918_v55 = vpop.f32.mrb[29].mxu1 }
 0x29a   : > { %v919_v56 = vadd.f32 %v1563_v22, %v918_v55  ;;  %v1734_v57 = vpop.f32.mrb[30].mxu1 }
 0x29b   : > { %v930_v58 = vadd.f32 %v1734_v57, %v1563_v22  ;;  %v921_v59 = vpop.f32.mrb[31].mxu1 }
 0x29c   : > { %v922_v60 = vadd.f32 %v1563_v22, %v921_v59 }
 0x29d   : > { %v940_v61 = vpack.c.bf16 %v930_v58, %v927_v54 }
 0x29e   : > { %v939_v62 = vpack.c.bf16 %v922_v60, %v919_v56 }
 0x2a0   : > { %1763 = vmatprep.mubr.bf16.mxu1 %v939_v62 }
 0x2a1   : > { %1764 = vmatmul.mubr.bf16.gmra.mrb[44].mxu1 %v940_v61  ;;  %v1151_v61 = vlaneseq }
 0x2a3   : > { %v1152_v62 = vshrl.u32 %v1151_v61, 7 }
 0x2a5   : > { %v1153_v63 = vsub.s32 0, %v1152_v62  ;;  %v1157_v1 = vsub.s32 1, %v1152_v62 }
 0x2a7   : > { %v2544_v2 = vrot.slane %v1149_v0, %v1153_v63 }
 0x354   : > { %v1753_v5 = vpop.f32.mrb[32].mxu1 }
 0x355   : > { %v1055_v6 = vadd.f32 %v1753_v5, %v1572_v4  ;;  %v1046_v7 = vpop.f32.mrb[33].mxu1 }
 0x356   : > { %v1047_v9 = vadd.f32 %v1572_v4, %v1046_v7  ;;  %v1754_v42 = vpop.f32.mrb[34].mxu1 }
 0x357   : > { %v1058_v10 = vadd.f32 %v1754_v42, %v1572_v4  ;;  %v1049_v11 = vpop.f32.mrb[35].mxu1  ;;  %v1111_v13 = vmax.f32 %v1055_v6, 0.0 }
 0x358   : > { %v1050_v12 = vadd.f32 %v1572_v4, %v1049_v11  ;;  %v1109_v14 = vmax.f32 %v1047_v9, 0.0 }
 0x359   : > { %v1112_v8 = vmax.f32 %v1058_v10, 0.0 }
 0x35a   : > { %v1110_v15 = vmax.f32 %v1050_v12, 0.0 }
 0x35b   : > { %v1126_v16 = vpack.c.bf16 %v1112_v8, %v1111_v13 }
 0x35c   : > { %v1125_v17 = vpack.c.bf16 %v1110_v15, %v1109_v14 }
 0x35e   : > { %1274 = vmatmul.mubr.bf16.vlgmr.msra.gmra.mrb[16].mxu0 %v1125_v17 }
 0x35f   : > { %1283 = vmatprep.mubr.bf16.mxu0 %v2184_v3 }
 0x364   : > { %v1757_v18 = vpop.f32.mrb[36].mxu1 }
 0x365   : > { %v1071_v19 = vadd.f32 %v1757_v18, %v1572_v4  ;;  %v1062_v20 = vpop.f32.mrb[37].mxu1 }
 0x366   : > { %v1063_v21 = vadd.f32 %v1572_v4, %v1062_v20  ;;  %v1758_v22 = vpop.f32.mrb[38].mxu1  ;;  %1284 = vmatmul.mubr.bf16.gmra.mrb[20].mxu0 %v1126_v16 }
 0x367   : > { %v1074_v23 = vadd.f32 %v1758_v22, %v1572_v4  ;;  %v1065_v24 = vpop.f32.mrb[39].mxu1  ;;  %1293 = vmatprep.mubr.bf16.mxu0 %v2184_v3  ;;  %v1115_v26 = vmax.f32 %v1071_v19, 0.0 }
 0x368   : > { %v1066_v25 = vadd.f32 %v1572_v4, %v1065_v24  ;;  %v1113_v28 = vmax.f32 %v1063_v21, 0.0 }
 0x369   : > { %v1116_v27 = vmax.f32 %v1074_v23, 0.0 }
 0x36a   : > { %v1114_v29 = vmax.f32 %v1066_v25, 0.0 }
 0x36b   : > { %v1128_v30 = vpack.c.bf16 %v1116_v27, %v1115_v26 }
 0x36c   : > { %v1127_v31 = vpack.c.bf16 %v1114_v29, %v1113_v28  ;;  %v1761_v32 = vpop.f32.mrb[40].mxu1 }
 0x36d   : > { %v1087_v33 = vadd.f32 %v1761_v32, %v1572_v4  ;;  %v1078_v34 = vpop.f32.mrb[41].mxu1 }
 0x36e   : > { %v1079_v35 = vadd.f32 %v1572_v4, %v1078_v34  ;;  %v1762_v36 = vpop.f32.mrb[42].mxu1  ;;  %1294 = vmatmul.mubr.bf16.gmra.mrb[24].mxu0 %v1127_v31 }
 0x36f   : > { %v1119_v37 = vmax.f32 %v1087_v33, 0.0  ;;  %v1090_v38 = vadd.f32 %v1762_v36, %v1572_v4  ;;  %v1081_v39 = vpop.f32.mrb[43].mxu1  ;;  %1303 = vmatprep.mubr.bf16.mxu0 %v2184_v3 }
 0x370   : > { %v1082_v41 = vadd.f32 %v1572_v4, %v1081_v39  ;;  %v1117_v44 = vmax.f32 %v1079_v35, 0.0 }
 0x371   : > { %v1120_v43 = vmax.f32 %v1090_v38, 0.0 }
 0x372   : > { %v1118_v45 = vmax.f32 %v1082_v41, 0.0 }
 0x373   : > { %v1130_v46 = vpack.c.bf16 %v1120_v43, %v1119_v37 }
 0x374   : > { %v1129_v47 = vpack.c.bf16 %v1118_v45, %v1117_v44  ;;  %v1765_v48 = vpop.f32.mrb[44].mxu1 }
 0x375   : > { %v1103_v49 = vadd.f32 %v1765_v48, %v1572_v4  ;;  %v1094_v50 = vpop.f32.mrb[45].mxu1 }
 0x376   : > { %1304 = vmatmul.mubr.bf16.gmra.mrb[28].mxu0 %v1128_v30  ;;  %v1095_v51 = vadd.f32 %v1572_v4, %v1094_v50  ;;  %v1766_v52 = vpop.f32.mrb[46].mxu1 }
 0x377   : > { %v1123_v40 = vmax.f32 %v1103_v49, 0.0  ;;  %v1106_v53 = vadd.f32 %v1766_v52, %v1572_v4  ;;  %v1097_v54 = vpop.f32.mrb[47].mxu1  ;;  %1313 = vmatprep.mubr.bf16.mxu0 %v2184_v3 }
 0x378   : > { %v1121_v55 = vmax.f32 %v1095_v51, 0.0  ;;  %v1098_v56 = vadd.f32 %v1572_v4, %v1097_v54  ;;  %v2546_v4 = vrot.slane %v1149_v0, %v1157_v1 }
 0x379   : > { %v1124_v57 = vmax.f32 %v1106_v53, 0.0 }
 0x37a   : > { %v1122_v58 = vmax.f32 %v1098_v56, 0.0 }
 0x37b   : > { %v1132_v59 = vpack.c.bf16 %v1124_v57, %v1123_v40 }
 0x37c   : > { %v1131_v60 = vpack.c.bf16 %v1122_v58, %v1121_v55 }
 0x37e   : > { %1314 = vmatmul.mubr.bf16.gmra.mrb[32].mxu0 %v1129_v47 }
 0x37f   : > { %1323 = vmatprep.mubr.bf16.mxu0 %v2184_v3 }
 0x386   : > { %1324 = vmatmul.mubr.bf16.gmra.mrb[36].mxu0 %v1130_v46 }
 0x387   : > { %1333 = vmatprep.mubr.bf16.mxu0 %v2184_v3 }
 0x38e   : > { %1334 = vmatmul.mubr.bf16.gmra.mrb[40].mxu0 %v1131_v60 }
 0x38f   : > { %1343 = vmatprep.mubr.bf16.mxu0 %v2184_v3 }
 0x396   : > { %1344 = vmatmul.mubr.bf16.gmra.mrb[44].mxu0 %v1132_v59 }
 0x431   : > { %v1275_v5 = vpop.f32.mrb[16].mxu0 }
 0x432   : > { %v1276_v6 = vadd.f32 %v1275_v5, %v2544_v2  ;;  %v1277_v7 = vpop.f32.mrb[17].mxu0 }
 0x433   : > { %v1278_v3 = vadd.f32 %v1277_v7, %v2546_v4  ;;  %v1279_v9 = vpop.f32.mrb[18].mxu0 }
 0x434   : > { %1354 = vst [vmem:[%s2550_s16] sm:$0xff] %v1276_v6  ;;  %v1280_v42 = vadd.f32 %v1279_v9, %v2544_v2  ;;  %v1281_v10 = vpop.f32.mrb[19].mxu0 }
 0x435   : > { %1355 = vst [vmem:[%s2550_s16 + $0x8] sm:$0xff] %v1278_v3  ;;  %v1282_v11 = vadd.f32 %v1281_v10, %v2546_v4 }
 0x436   : > { %1356 = vst [vmem:[%s2550_s16 + $0x10] sm:$0xff] %v1280_v42 }
 0x437   : > { %1357 = vst [vmem:[%s2550_s16 + $0x18] sm:$0xff] %v1282_v11 }
 0x439   : > { %v1285_v12 = vpop.f32.mrb[20].mxu0 }
 0x43a   : > { %v1286_v13 = vadd.f32 %v1285_v12, %v2544_v2  ;;  %v1287_v8 = vpop.f32.mrb[21].mxu0 }
 0x43b   : > { %v1288_v14 = vadd.f32 %v1287_v8, %v2546_v4  ;;  %v1289_v15 = vpop.f32.mrb[22].mxu0 }
 0x43c   : > { %1358 = vst [vmem:[%s2550_s16 + $0x20] sm:$0xff] %v1286_v13  ;;  %v1290_v16 = vadd.f32 %v1289_v15, %v2544_v2  ;;  %v1291_v17 = vpop.f32.mrb[23].mxu0 }
 0x43d   : > { %1359 = vst [vmem:[%s2550_s16 + $0x28] sm:$0xff] %v1288_v14  ;;  %v1292_v18 = vadd.f32 %v1291_v17, %v2546_v4 }
 0x43e   : > { %1360 = vst [vmem:[%s2550_s16 + $0x30] sm:$0xff] %v1290_v16 }
 0x43f   : > { %1361 = vst [vmem:[%s2550_s16 + $0x38] sm:$0xff] %v1292_v18 }
 0x441   : > { %v1295_v19 = vpop.f32.mrb[24].mxu0 }
 0x442   : > { %v1296_v20 = vadd.f32 %v1295_v19, %v2544_v2  ;;  %v1297_v21 = vpop.f32.mrb[25].mxu0 }
 0x443   : > { %v1298_v22 = vadd.f32 %v1297_v21, %v2546_v4  ;;  %v1299_v23 = vpop.f32.mrb[26].mxu0 }
 0x444   : > { %1362 = vst [vmem:[%s2550_s16 + $0x40] sm:$0xff] %v1296_v20  ;;  %v1300_v24 = vadd.f32 %v1299_v23, %v2544_v2  ;;  %v1301_v25 = vpop.f32.mrb[27].mxu0 }
 0x445   : > { %1363 = vst [vmem:[%s2550_s16 + $0x48] sm:$0xff] %v1298_v22  ;;  %v1302_v26 = vadd.f32 %v1301_v25, %v2546_v4 }
 0x446   : > { %1364 = vst [vmem:[%s2550_s16 + $0x50] sm:$0xff] %v1300_v24 }
 0x447   : > { %1365 = vst [vmem:[%s2550_s16 + $0x58] sm:$0xff] %v1302_v26 }
 0x449   : > { %v1305_v27 = vpop.f32.mrb[28].mxu0 }
 0x44a   : > { %v1306_v28 = vadd.f32 %v1305_v27, %v2544_v2  ;;  %v1307_v29 = vpop.f32.mrb[29].mxu0 }
 0x44b   : > { %v1308_v30 = vadd.f32 %v1307_v29, %v2546_v4  ;;  %v1309_v31 = vpop.f32.mrb[30].mxu0 }
 0x44c   : > { %1366 = vst [vmem:[%s2550_s16 + $0x60] sm:$0xff] %v1306_v28  ;;  %v1310_v32 = vadd.f32 %v1309_v31, %v2544_v2  ;;  %v1311_v33 = vpop.f32.mrb[31].mxu0 }
 0x44d   : > { %1367 = vst [vmem:[%s2550_s16 + $0x68] sm:$0xff] %v1308_v30  ;;  %v1312_v34 = vadd.f32 %v1311_v33, %v2546_v4 }
 0x44e   : > { %1368 = vst [vmem:[%s2550_s16 + $0x70] sm:$0xff] %v1310_v32 }
 0x44f   : > { %1369 = vst [vmem:[%s2550_s16 + $0x78] sm:$0xff] %v1312_v34 }
 0x451   : > { %v1315_v35 = vpop.f32.mrb[32].mxu0 }
 0x452   : > { %v1316_v36 = vadd.f32 %v1315_v35, %v2544_v2  ;;  %v1317_v37 = vpop.f32.mrb[33].mxu0 }
 0x453   : > { %v1318_v38 = vadd.f32 %v1317_v37, %v2546_v4  ;;  %v1319_v39 = vpop.f32.mrb[34].mxu0 }
 0x454   : > { %1370 = vst [vmem:[%s2550_s16 + $0x80] sm:$0xff] %v1316_v36  ;;  %v1320_v41 = vadd.f32 %v1319_v39, %v2544_v2  ;;  %v1321_v43 = vpop.f32.mrb[35].mxu0 }
 0x455   : > { %1371 = vst [vmem:[%s2550_s16 + $0x88] sm:$0xff] %v1318_v38  ;;  %v1322_v44 = vadd.f32 %v1321_v43, %v2546_v4 }
 0x456   : > { %1372 = vst [vmem:[%s2550_s16 + $0x90] sm:$0xff] %v1320_v41 }
 0x457   : > { %1373 = vst [vmem:[%s2550_s16 + $0x98] sm:$0xff] %v1322_v44 }
 0x459   : > { %v1325_v45 = vpop.f32.mrb[36].mxu0 }
 0x45a   : > { %v1326_v46 = vadd.f32 %v1325_v45, %v2544_v2  ;;  %v1327_v47 = vpop.f32.mrb[37].mxu0 }
 0x45b   : > { %v1328_v48 = vadd.f32 %v1327_v47, %v2546_v4  ;;  %v1329_v49 = vpop.f32.mrb[38].mxu0 }
 0x45c   : > { %1374 = vst [vmem:[%s2550_s16 + $0xa0] sm:$0xff] %v1326_v46  ;;  %v1330_v50 = vadd.f32 %v1329_v49, %v2544_v2  ;;  %v1331_v51 = vpop.f32.mrb[39].mxu0 }
 0x45d   : > { %1375 = vst [vmem:[%s2550_s16 + $0xa8] sm:$0xff] %v1328_v48  ;;  %v1332_v52 = vadd.f32 %v1331_v51, %v2546_v4 }
 0x45e   : > { %1376 = vst [vmem:[%s2550_s16 + $0xb0] sm:$0xff] %v1330_v50 }
 0x45f   : > { %1377 = vst [vmem:[%s2550_s16 + $0xb8] sm:$0xff] %v1332_v52 }
 0x461   : > { %v1335_v40 = vpop.f32.mrb[40].mxu0 }
 0x462   : > { %v1336_v53 = vadd.f32 %v1335_v40, %v2544_v2  ;;  %v1337_v54 = vpop.f32.mrb[41].mxu0 }
 0x463   : > { %v1338_v55 = vadd.f32 %v1337_v54, %v2546_v4  ;;  %v1339_v56 = vpop.f32.mrb[42].mxu0 }
 0x464   : > { %1378 = vst [vmem:[%s2550_s16 + $0xc0] sm:$0xff] %v1336_v53  ;;  %v1340_v57 = vadd.f32 %v1339_v56, %v2544_v2  ;;  %v1341_v58 = vpop.f32.mrb[43].mxu0 }
 0x465   : > { %1379 = vst [vmem:[%s2550_s16 + $0xc8] sm:$0xff] %v1338_v55  ;;  %v1342_v59 = vadd.f32 %v1341_v58, %v2546_v4 }
 0x466   : > { %1380 = vst [vmem:[%s2550_s16 + $0xd0] sm:$0xff] %v1340_v57 }
 0x467   : > { %1381 = vst [vmem:[%s2550_s16 + $0xd8] sm:$0xff] %v1342_v59 }
 0x469   : > { %v1345_v60 = vpop.f32.mrb[44].mxu0 }
 0x46a   : > { %v1346_v61 = vadd.f32 %v1345_v60, %v2544_v2  ;;  %v1347_v62 = vpop.f32.mrb[45].mxu0 }
 0x46b   : > { %v1348_v63 = vadd.f32 %v1347_v62, %v2546_v4  ;;  %v1349_v0 = vpop.f32.mrb[46].mxu0 }
 0x46c   : > { %1382 = vst [vmem:[%s2550_s16 + $0xe0] sm:$0xff] %v1346_v61  ;;  %v1350_v1 = vadd.f32 %v1349_v0, %v2544_v2  ;;  %v1351_v5 = vpop.f32.mrb[47].mxu0 }
 0x46d   : > { %1383 = vst [vmem:[%s2550_s16 + $0xe8] sm:$0xff] %v1348_v63  ;;  %v1352_v6 = vadd.f32 %v1351_v5, %v2546_v4 }
 0x46e   : > { %1384 = vst [vmem:[%s2550_s16 + $0xf0] sm:$0xff] %v1350_v1 }
 0x46f   : > { %1385 = vst [vmem:[%s2550_s16 + $0xf8] sm:$0xff] %v1352_v6 }
 0x470   : > { %2112 = shalt.err (!%p2109_p13)
}
 0x471   : > { %s2113_s22 = scalar_lea.hbm %s2615_s17, 4096  ;;  %s2117_s16 = scalar_lea.hbm %s2698_s15, 8192 }
 0x472   : > { %p2114_p9 = scmp.ne.s32.totalorder %s2615_s17, %s2113_s22  ;;  %p2118_p4 = scmp.lt.u32.totalorder %s2615_s17, %s2698_s15 }
 0x473   : > { %p2119_p8 = scmp.lt.u32.totalorder %s2117_s16, %s2113_s22  ;;  %p2121_p10 = scmp.lt.u32.totalorder %s2113_s22, %s2615_s17 }
 0x474   : > { %p2115_p0 = pnand %p2114_p9, %p2412_p3 }
 0x475   : > { %p2120_p6 = por %p2119_p8, %p2118_p4 }
 0x476   : > { %p2116_p11 = pneg %p2115_p0 }
 0x477   : > { %p2122_p5 = por %p2121_p10, %p2120_p6 }
 0x479   : > { %p2123_p7 = pnand %p2122_p5, %p2116_p11 }
 0x47b   : > { %2126 = shalt.err (!%p2123_p7)
}
 0x47c   : > { %s2186_s29 = smov 256   ;;  %s2187_s25 = smov 16  }
 0x47d   : > { %1801 = dma.vmem_to_hbm [thread:$0]  (%p2412_p3), %s2617_s21, 4096, %s2615_s17, %s1387_s13, %s2186_s29, %s2186_s29, %s2187_s25  }
 0x47e PF: > { %s2699_s14 = sld [smem:[#allocation16_spill]]  ;;  %s2700_s19 = sld [smem:[#allocation17_spill]] }
 0x47f   : > { %p2702_p1 = scmp.ge.s32.totalorder %s2173_s12, 2 }
 0x484   : > { %s1416_s26 = sand.u32 1, %s2699_s14   ;;  %p2701_p12 = scmp.ne.s32.totalorder %s2700_s19, 0 }
 0x485   : > { %s1417_s22 = scalar_lea.sflag [#allocation4], %s1416_s26 }
 0x486   : > { %p1821_p2 = pnand %p2702_p1, %p2701_p12 }
 0x488   : > { %2156 = dma.done.wait (!%p1821_p2), %s1417_s22, 4096  }
 0x489   : > { %2158 = vsyncadd (!%p1821_p2), %s1417_s22, 4294963200  ;;  %p24_p13 = scmp.ge.s32.totalorder %s2399_s9, 4   ;;  %s2703_s30 = smov %s2165_s10 }
 0x48a   : > { %s2704_s10 = smov %s2169_s11  ;;  %s2705_s11 = smov %s2408_s28 }
 0x48b   : > { %s2706_s12 = smov %s2399_s9  ;;  %26 = sbr.rel (!%p24_p13) target bundleno = 9 (0x9), region = 117 }
 0x492   :  { %1422 = vsyncpa [#allocation3], 1 }
 0x493   :  { %1424 = vsyncpa [#allocation3 + $0x1], 1 }
 0x494   :  { %1425 = vsyncpa [#allocation6], 1 }
 0x495   :  { %1426 = vsyncpa [#allocation9], 1 }
 0x496   :  { %1427 = vsyncpa [#allocation4], 1 }
 0x497   :  { %1429 = vsyncpa [#allocation4 + $0x1], 1 }

</bundles_post_ra>
